<compile_context>
chip_gen: v7x
topology: tpu7x:2x2x1
jax: 0.10.0
libtpu: 0.0.40
codegen_flags: <defaults>
</compile_context>

<pallas_src>
import math

import jax
import jax.numpy as jnp
from jax.experimental import pallas as pl
from jax.experimental.pallas import tpu as pltpu


def _encoder_fwd_kernel(patches_ref, wconv_ref, bconv_ref,
                        wmu_ref, bmu_ref, wlv_ref, blv_ref, eps_ref,
                        mu_ref, logvar_ref, z_ref):
    """Fused conv1d + fc_mu / fc_logvar (+ReLU) + reparameterize for one batch tile.

    patches_ref : (TB, len_flat, K) f32   im2col'd circularly-padded input
    wconv_ref   : (1, 1, K) f32           conv filter
    bconv_ref   : (1, 1) f32              conv bias
    wmu_ref     : (len_flat, latent) f32  fc_mu weight (already transposed)
    bmu_ref     : (1, latent) f32
    wlv_ref     : (len_flat, latent) f32  fc_logvar weight (already transposed)
    blv_ref     : (1, latent) f32
    eps_ref     : (TB, latent) f32        pre-scaled N(0, eps_weight) noise
    """
    patches = patches_ref[...]                               # (TB, F, K)
    # 1->1 channel conv == per-position dot with the K-tap filter:
    # VPU multiply + XLU lane reduction (tiny K, no reshape needed).
    h = jnp.sum(patches * wconv_ref[...], axis=-1)           # (TB, F)
    h = h + bconv_ref[...]                                   # (1,1) broadcast

    mu = jnp.maximum(
        jnp.dot(h, wmu_ref[...], preferred_element_type=jnp.float32) + bmu_ref[...],
        0.0)                                                 # (TB, latent)
    log_var = jnp.maximum(
        jnp.dot(h, wlv_ref[...], preferred_element_type=jnp.float32) + blv_ref[...],
        0.0)

    mu_ref[...] = mu
    logvar_ref[...] = log_var
    # Reparameterize epilogue: z = mu + eps * exp(0.5 * log_var)
    z_ref[...] = mu + eps_ref[...] * jnp.exp(0.5 * log_var)


def encoder_conv_shallow_forward(x, w_conv, b_conv, w_mu, b_mu, w_lv, b_lv, eps,
                                 *, kernel_size, stride, padding):
    """Pallas forward of Encoder_conv_shallow. Returns (mu, log_var, z), each (B,1,latent)."""
    B = x.shape[0]
    n_sensors = x.shape[-1]
    latent = w_mu.shape[0]
    len_flat = int((n_sensors - kernel_size + 2 * padding) // stride + 1)

    x2 = x.reshape(B, n_sensors).astype(jnp.float32)            # in_channels == 1
    # Circular padding + im2col: pure data movement (layout plumbing), no FLOPs.
    x_pad = jnp.concatenate(
        [x2[:, n_sensors - padding:], x2, x2[:, :padding]], axis=-1)
    idx = jnp.arange(len_flat)[:, None] * stride + jnp.arange(kernel_size)[None, :]
    patches = x_pad[:, idx]                                      # (B, len_flat, K)

    wconv = w_conv.reshape(1, 1, kernel_size).astype(jnp.float32)
    bconv = jnp.asarray(b_conv, jnp.float32).reshape(1, 1)
    wmu_t = w_mu.astype(jnp.float32).T                           # (len_flat, latent)
    wlv_t = w_lv.astype(jnp.float32).T
    bmu = b_mu.astype(jnp.float32).reshape(1, latent)
    blv = b_lv.astype(jnp.float32).reshape(1, latent)
    eps = eps.astype(jnp.float32).reshape(B, latent)

    # Batch tile: whole batch if small, else 512-row tiles (multiple of 8) so the
    # double-buffered in/out blocks stay well under v7x's 64 MiB VMEM.
    tb = B if B <= 512 else 512
    grid = (pl.cdiv(B, tb),)

    out_sds = jax.ShapeDtypeStruct((B, latent), jnp.float32)
    mu, log_var, z = pl.pallas_call(
        _encoder_fwd_kernel,
        out_shape=(out_sds, out_sds, out_sds),
        grid=grid,
        in_specs=[
            pl.BlockSpec((tb, len_flat, kernel_size), lambda i: (i, 0, 0)),  # patches
            pl.BlockSpec((1, 1, kernel_size), lambda i: (0, 0, 0)),          # conv weight
            pl.BlockSpec((1, 1), lambda i: (0, 0)),                          # conv bias
            pl.BlockSpec((len_flat, latent), lambda i: (0, 0)),              # W_mu^T
            pl.BlockSpec((1, latent), lambda i: (0, 0)),                     # b_mu
            pl.BlockSpec((len_flat, latent), lambda i: (0, 0)),              # W_logvar^T
            pl.BlockSpec((1, latent), lambda i: (0, 0)),                     # b_logvar
            pl.BlockSpec((tb, latent), lambda i: (i, 0)),                    # eps
        ],
        out_specs=[
            pl.BlockSpec((tb, latent), lambda i: (i, 0)),                    # mu
            pl.BlockSpec((tb, latent), lambda i: (i, 0)),                    # log_var
            pl.BlockSpec((tb, latent), lambda i: (i, 0)),                    # z
        ],
        compiler_params=pltpu.CompilerParams(
            dimension_semantics=("parallel",),   # shard batch tiles across v7x's 2 TCs
            vmem_limit_bytes=32 * 1024 * 1024,
        ),
    )(patches, wconv, bconv, wmu_t, bmu, wlv_t, blv, eps)

    # Restore the PyTorch channel dim: (B, 1, latent)
    return (mu.reshape(B, 1, latent),
            log_var.reshape(B, 1, latent),
            z.reshape(B, 1, latent))


class EncoderConvShallowPallas:
    """JAX/Pallas mirror of the PyTorch Encoder_conv_shallow."""

    def __init__(self, latent_dims: int = 12, n_sensors: int = 180,
                 kernel_overlap: float = 0.25, kernel_size=None,
                 eps_weight: float = 1.0, *, key):
        self.name = "conv_shallow"
        self.latent_dims = latent_dims
        self.n_sensors = n_sensors
        self.in_channels = 1
        if kernel_size is None:
            ks = round(n_sensors * kernel_overlap)
            ks = ks + 1 if ks % 2 == 0 else ks
        else:
            ks = kernel_size
        self.kernel_size = int(ks)
        self.padding = self.kernel_size // 3
        self.stride = self.padding
        self.eps_weight = float(eps_weight)
        self.len_flat = int((n_sensors - self.kernel_size + 2 * self.padding)
                            // self.stride + 1)

        kcw, kcb, kmw, kmb, klw, klb = jax.random.split(key, 6)
        bc = 1.0 / math.sqrt(self.in_channels * self.kernel_size)
        bl = 1.0 / math.sqrt(self.len_flat)
        self.w_conv = jax.random.uniform(kcw, (self.kernel_size,), jnp.float32, -bc, bc)
        self.b_conv = jax.random.uniform(kcb, (), jnp.float32, -bc, bc)
        self.w_mu = jax.random.uniform(kmw, (self.latent_dims, self.len_flat),
                                       jnp.float32, -bl, bl)
        self.b_mu = jax.random.uniform(kmb, (self.latent_dims,), jnp.float32, -bl, bl)
        self.w_logvar = jax.random.uniform(klw, (self.latent_dims, self.len_flat),
                                           jnp.float32, -bl, bl)
        self.b_logvar = jax.random.uniform(klb, (self.latent_dims,), jnp.float32, -bl, bl)

    def sample_eps(self, noise_key, batch):
        # eps ~ Normal(0, eps_weight): eps_weight is the noise std, as in the PyTorch code.
        # TODO(synk): noise is drawn with jax.random here instead of the on-chip TPU PRNG
        #             (pltpu.prng_* has no interpret/CPU lowering); distribution is identical.
        return self.eps_weight * jax.random.normal(
            noise_key, (batch, self.latent_dims), dtype=jnp.float32)

    def forward(self, x, noise_key):
        eps = self.sample_eps(noise_key, x.shape[0])
        return encoder_conv_shallow_forward(
            x, self.w_conv, self.b_conv, self.w_mu, self.b_mu,
            self.w_logvar, self.b_logvar, eps,
            kernel_size=self.kernel_size, stride=self.stride, padding=self.padding)

    __call__ = forward

    # TODO(synk): torch.save / torch.load state-dict persistence not translated.


def _reference_forward(enc, x, noise_key):
    """Pure-JAX reference of the same forward (for correctness checking)."""
    B = x.shape[0]
    n = enc.n_sensors
    x2 = x.reshape(B, n).astype(jnp.float32)
    p, k, s = enc.padding, enc.kernel_size, enc.stride
    x_pad = jnp.concatenate([x2[:, n - p:], x2, x2[:, :p]], axis=-1)
    idx = jnp.arange(enc.len_flat)[:, None] * s + jnp.arange(k)[None, :]
    h = jnp.sum(x_pad[:, idx] * enc.w_conv[None, None, :], axis=-1) + enc.b_conv
    hp = jax.lax.Precision.HIGHEST
    mu = jax.nn.relu(jnp.dot(h, enc.w_mu.T, precision=hp) + enc.b_mu)
    lv = jax.nn.relu(jnp.dot(h, enc.w_logvar.T, precision=hp) + enc.b_logvar)
    eps = enc.sample_eps(noise_key, B)
    z = mu + eps * jnp.exp(0.5 * lv)
    L = enc.latent_dims
    return mu.reshape(B, 1, L), lv.reshape(B, 1, L), z.reshape(B, 1, L)


if __name__ == "__main__":
    root = jax.random.PRNGKey(0)
    k_init, k_x, k_eps = jax.random.split(root, 3)

    batch, n_sensors, latent_dims = 2, 180, 12
    enc = EncoderConvShallowPallas(latent_dims=latent_dims, n_sensors=n_sensors,
                                   kernel_overlap=0.25, eps_weight=1.0, key=k_init)
    assert enc.kernel_size == 45 and enc.stride == 15 and enc.len_flat == 12

    x = jax.random.normal(k_x, (batch, 1, n_sensors), dtype=jnp.float32)

    mu, log_var, z = enc.forward(x, k_eps)
    mu, log_var, z = jax.block_until_ready((mu, log_var, z))

    assert mu.shape == (batch, 1, latent_dims) and mu.dtype == jnp.float32
    assert log_var.shape == (batch, 1, latent_dims)
    assert z.shape == (batch, 1, latent_dims)
    assert bool(jnp.all(jnp.isfinite(z)))

    # Check against a pure-JAX reference of the same forward.
    mu_r, lv_r, z_r = _reference_forward(enc, x, k_eps)
    assert bool(jnp.allclose(mu, mu_r, atol=1e-3, rtol=1e-3)), "mu mismatch"
    assert bool(jnp.allclose(log_var, lv_r, atol=1e-3, rtol=1e-3)), "log_var mismatch"
    assert bool(jnp.allclose(z, z_r, atol=2e-3, rtol=2e-3)), "z mismatch"

    # Deterministic path: eps_weight = 0 must give z == mu exactly.
    enc0 = EncoderConvShallowPallas(latent_dims=latent_dims, n_sensors=n_sensors,
                                    kernel_overlap=0.25, eps_weight=0.0, key=k_init)
    mu0, lv0, z0 = jax.block_until_ready(enc0.forward(x, k_eps))
    assert bool(jnp.array_equal(z0, mu0)), "eps_weight=0 must return z == mu"

    print("KERNEL_OK")
</pallas_src>

<mosaic_0001>
module attributes {stable_mosaic.version = 11 : i64} {
  func.func @_encoder_fwd_kernel(%arg0: i32, %arg1: memref<2x12x45xf32, #tpu.memory_space<vmem>>, %arg2: memref<1x1x45xf32, #tpu.memory_space<vmem>>, %arg3: memref<1x1xf32, #tpu.memory_space<vmem>>, %arg4: memref<12x12xf32, #tpu.memory_space<vmem>>, %arg5: memref<1x12xf32, #tpu.memory_space<vmem>>, %arg6: memref<12x12xf32, #tpu.memory_space<vmem>>, %arg7: memref<1x12xf32, #tpu.memory_space<vmem>>, %arg8: memref<2x12xf32, #tpu.memory_space<vmem>>, %arg9: memref<2x12xf32, #tpu.memory_space<vmem>>, %arg10: memref<2x12xf32, #tpu.memory_space<vmem>>, %arg11: memref<2x12xf32, #tpu.memory_space<vmem>>) attributes {dimension_semantics = [#tpu.dimension_semantics<parallel>], iteration_bounds = array<i64: 1>, scalar_prefetch = 0 : i64, scratch_operands = 0 : i64, tpu.core_type = #tpu.core_type<tc>, window_params = [{transform_indices = @transform_0, window_bounds = array<i64: 2, 12, 45>}, {pipeline_mode = #tpu.pipeline_mode<synchronous>, transform_indices = @transform_1, window_bounds = array<i64: 1, 1, 45>}, {pipeline_mode = #tpu.pipeline_mode<synchronous>, transform_indices = @transform_2, window_bounds = array<i64: 1, 1>}, {pipeline_mode = #tpu.pipeline_mode<synchronous>, transform_indices = @transform_3, window_bounds = array<i64: 12, 12>}, {pipeline_mode = #tpu.pipeline_mode<synchronous>, transform_indices = @transform_4, window_bounds = array<i64: 1, 12>}, {pipeline_mode = #tpu.pipeline_mode<synchronous>, transform_indices = @transform_5, window_bounds = array<i64: 12, 12>}, {pipeline_mode = #tpu.pipeline_mode<synchronous>, transform_indices = @transform_6, window_bounds = array<i64: 1, 12>}, {transform_indices = @transform_7, window_bounds = array<i64: 2, 12>}, {transform_indices = @transform_8, window_bounds = array<i64: 2, 12>}, {transform_indices = @transform_9, window_bounds = array<i64: 2, 12>}, {transform_indices = @transform_10, window_bounds = array<i64: 2, 12>}]} {
    %c0 = arith.constant 0 : index
    %c0_0 = arith.constant 0 : index
    %c0_1 = arith.constant 0 : index
    %0 = vector.load %arg1[%c0, %c0_0, %c0_1] : memref<2x12x45xf32, #tpu.memory_space<vmem>>, vector<2x12x45xf32>
    %c0_2 = arith.constant 0 : index
    %c0_3 = arith.constant 0 : index
    %c0_4 = arith.constant 0 : index
    %1 = vector.load %arg2[%c0_2, %c0_3, %c0_4] : memref<1x1x45xf32, #tpu.memory_space<vmem>>, vector<1x1x45xf32>
    %2 = vector.broadcast %1 : vector<1x1x45xf32> to vector<2x12x45xf32>
    %3 = arith.mulf %0, %2 : vector<2x12x45xf32>
    %cst = arith.constant dense<0.000000e+00> : vector<2x12xf32>
    %4 = vector.multi_reduction <add>, %3, %cst [2] : vector<2x12x45xf32> to vector<2x12xf32>
    %c0_5 = arith.constant 0 : index
    %c0_6 = arith.constant 0 : index
    %5 = vector.load %arg3[%c0_5, %c0_6] : memref<1x1xf32, #tpu.memory_space<vmem>>, vector<1x1xf32>
    %6 = vector.broadcast %5 : vector<1x1xf32> to vector<2x12xf32>
    %7 = arith.addf %4, %6 : vector<2x12xf32>
    %c0_7 = arith.constant 0 : index
    %c0_8 = arith.constant 0 : index
    %8 = vector.load %arg4[%c0_7, %c0_8] : memref<12x12xf32, #tpu.memory_space<vmem>>, vector<12x12xf32>
    %cst_9 = arith.constant dense<0.000000e+00> : vector<2x12xf32>
    %9 = tpu.matmul %7, %8, %cst_9 {dimension_numbers = #tpu.dot_dimension_numbers<[1], [0], [0], [1], [0, 0, 1, 1], [], []>} : vector<2x12xf32>, vector<12x12xf32>, vector<2x12xf32> -> vector<2x12xf32>
    %c0_10 = arith.constant 0 : index
    %c0_11 = arith.constant 0 : index
    %10 = vector.load %arg5[%c0_10, %c0_11] : memref<1x12xf32, #tpu.memory_space<vmem>>, vector<1x12xf32>
    %11 = vector.broadcast %10 : vector<1x12xf32> to vector<2x12xf32>
    %12 = arith.addf %9, %11 : vector<2x12xf32>
    %cst_12 = arith.constant 0.000000e+00 : f32
    %13 = vector.broadcast %cst_12 : f32 to vector<2x12xf32>
    %14 = arith.maximumf %12, %13 : vector<2x12xf32>
    %c0_13 = arith.constant 0 : index
    %c0_14 = arith.constant 0 : index
    %15 = vector.load %arg6[%c0_13, %c0_14] : memref<12x12xf32, #tpu.memory_space<vmem>>, vector<12x12xf32>
    %cst_15 = arith.constant dense<0.000000e+00> : vector<2x12xf32>
    %16 = tpu.matmul %7, %15, %cst_15 {dimension_numbers = #tpu.dot_dimension_numbers<[1], [0], [0], [1], [0, 0, 1, 1], [], []>} : vector<2x12xf32>, vector<12x12xf32>, vector<2x12xf32> -> vector<2x12xf32>
    %c0_16 = arith.constant 0 : index
    %c0_17 = arith.constant 0 : index
    %17 = vector.load %arg7[%c0_16, %c0_17] : memref<1x12xf32, #tpu.memory_space<vmem>>, vector<1x12xf32>
    %18 = vector.broadcast %17 : vector<1x12xf32> to vector<2x12xf32>
    %19 = arith.addf %16, %18 : vector<2x12xf32>
    %cst_18 = arith.constant 0.000000e+00 : f32
    %20 = vector.broadcast %cst_18 : f32 to vector<2x12xf32>
    %21 = arith.maximumf %19, %20 : vector<2x12xf32>
    %c0_19 = arith.constant 0 : index
    %c0_20 = arith.constant 0 : index
    %22 = vector.load %arg9[%c0_19, %c0_20] : memref<2x12xf32, #tpu.memory_space<vmem>>, vector<2x12xf32>
    tpu.vector_store %arg9[%c0_19, %c0_20], %14 {strides = array<i32>} : memref<2x12xf32, #tpu.memory_space<vmem>>, vector<2x12xf32>,
    %c0_21 = arith.constant 0 : index
    %c0_22 = arith.constant 0 : index
    %23 = vector.load %arg10[%c0_21, %c0_22] : memref<2x12xf32, #tpu.memory_space<vmem>>, vector<2x12xf32>
    tpu.vector_store %arg10[%c0_21, %c0_22], %21 {strides = array<i32>} : memref<2x12xf32, #tpu.memory_space<vmem>>, vector<2x12xf32>,
    %c0_23 = arith.constant 0 : index
    %c0_24 = arith.constant 0 : index
    %24 = vector.load %arg8[%c0_23, %c0_24] : memref<2x12xf32, #tpu.memory_space<vmem>>, vector<2x12xf32>
    %cst_25 = arith.constant 5.000000e-01 : f32
    %25 = vector.broadcast %cst_25 : f32 to vector<2x12xf32>
    %26 = arith.mulf %25, %21 : vector<2x12xf32>
    %27 = math.exp %26 : vector<2x12xf32>
    %28 = arith.mulf %24, %27 : vector<2x12xf32>
    %29 = arith.addf %14, %28 : vector<2x12xf32>
    %c0_26 = arith.constant 0 : index
    %c0_27 = arith.constant 0 : index
    %30 = vector.load %arg11[%c0_26, %c0_27] : memref<2x12xf32, #tpu.memory_space<vmem>>, vector<2x12xf32>
    tpu.vector_store %arg11[%c0_26, %c0_27], %29 {strides = array<i32>} : memref<2x12xf32, #tpu.memory_space<vmem>>, vector<2x12xf32>,
    return
  }
  func.func @transform_0(%arg0: i32) -> (i32, i32, i32) {
    %c0_i32 = arith.constant 0 : i32
    %c0_i32_0 = arith.constant 0 : i32
    %c0_i32_1 = arith.constant 0 : i32
    return %arg0, %c0_i32, %c0_i32_0 : i32, i32, i32
  }
  func.func @transform_1(%arg0: i32) -> (i32, i32, i32) {
    %c0_i32 = arith.constant 0 : i32
    %c0_i32_0 = arith.constant 0 : i32
    %c0_i32_1 = arith.constant 0 : i32
    %c0_i32_2 = arith.constant 0 : i32
    return %c0_i32, %c0_i32_0, %c0_i32_1 : i32, i32, i32
  }
  func.func @transform_2(%arg0: i32) -> (i32, i32) {
    %c0_i32 = arith.constant 0 : i32
    %c0_i32_0 = arith.constant 0 : i32
    %c0_i32_1 = arith.constant 0 : i32
    return %c0_i32, %c0_i32_0 : i32, i32
  }
  func.func @transform_3(%arg0: i32) -> (i32, i32) {
    %c0_i32 = arith.constant 0 : i32
    %c0_i32_0 = arith.constant 0 : i32
    %c0_i32_1 = arith.constant 0 : i32
    return %c0_i32, %c0_i32_0 : i32, i32
  }
  func.func @transform_4(%arg0: i32) -> (i32, i32) {
    %c0_i32 = arith.constant 0 : i32
    %c0_i32_0 = arith.constant 0 : i32
    %c0_i32_1 = arith.constant 0 : i32
    return %c0_i32, %c0_i32_0 : i32, i32
  }
  func.func @transform_5(%arg0: i32) -> (i32, i32) {
    %c0_i32 = arith.constant 0 : i32
    %c0_i32_0 = arith.constant 0 : i32
    %c0_i32_1 = arith.constant 0 : i32
    return %c0_i32, %c0_i32_0 : i32, i32
  }
  func.func @transform_6(%arg0: i32) -> (i32, i32) {
    %c0_i32 = arith.constant 0 : i32
    %c0_i32_0 = arith.constant 0 : i32
    %c0_i32_1 = arith.constant 0 : i32
    return %c0_i32, %c0_i32_0 : i32, i32
  }
  func.func @transform_7(%arg0: i32) -> (i32, i32) {
    %c0_i32 = arith.constant 0 : i32
    %c0_i32_0 = arith.constant 0 : i32
    return %arg0, %c0_i32 : i32, i32
  }
  func.func @transform_8(%arg0: i32) -> (i32, i32) {
    %c0_i32 = arith.constant 0 : i32
    %c0_i32_0 = arith.constant 0 : i32
    return %arg0, %c0_i32 : i32, i32
  }
  func.func @transform_9(%arg0: i32) -> (i32, i32) {
    %c0_i32 = arith.constant 0 : i32
    %c0_i32_0 = arith.constant 0 : i32
    return %arg0, %c0_i32 : i32, i32
  }
  func.func @transform_10(%arg0: i32) -> (i32, i32) {
    %c0_i32 = arith.constant 0 : i32
    %c0_i32_0 = arith.constant 0 : i32
    return %arg0, %c0_i32 : i32, i32
  }
}

</mosaic_0001>

<bundles_post_ra>
// kernel: tpu_custom_call.1
= control target key start
LH: loop header
LB: loop body
LE: loop exit
PB: predicated region body
PF: predicated region fallthrough
CT: control target
= control target key end

     0   :  { %s593_s0 = inlined_call_operand.vmem [shape: f32[2,12,45], index: 0, kind: input, shape index: {}]   ;;  %s594_s1 = inlined_call_operand.vmem [shape: f32[1,1,45], index: 1, kind: input, shape index: {}]   ;;  %s595_s2 = inlined_call_operand.<no memory space> [shape: f32[1,1], index: 2, kind: input, shape index: {}]   ;;  %s596_s3 = inlined_call_operand.vmem [shape: f32[12,12], index: 3, kind: input, shape index: {}]   ;;  %s597_s4 = inlined_call_operand.vmem [shape: f32[1,12], index: 4, kind: input, shape index: {}]   ;;  %s598_s5 = inlined_call_operand.vmem [shape: f32[12,12], index: 5, kind: input, shape index: {}]   ;;  %s599_s6 = inlined_call_operand.vmem [shape: f32[1,12], index: 6, kind: input, shape index: {}]   ;;  %s600_s7 = inlined_call_operand.vmem [shape: f32[2,12], index: 7, kind: input, shape index: {}]   ;;  %s601_s8 = inlined_call_operand.hbm [shape: f32[2,12], index: 8, kind: output, shape index: {0}]   ;;  %s602_s9 = inlined_call_operand.hbm [shape: f32[2,12], index: 9, kind: output, shape index: {1}]   ;;  %s603_s10 = inlined_call_operand.hbm [shape: f32[2,12], index: 10, kind: output, shape index: {2}]  }
   0x1   :  { %v16_v0 = vstv %s595_s2 }
   0x2   :  { %17 = vst [vmem:[#allocation2] sm:$0x1] %v16_v0 }
   0x3   :  { %18 = vsyncpa [#allocation4], 0  ;;  %v36_v1 = vld [vmem:[%s593_s0] sm:$0xff]  ;;  %vm51_vm0 = vcmask 367616   ;;  %v37_v3 = vld [vmem:[%s593_s0 + $0x8] sm:$0xf] }
   0x4   :  { %v328_v2 = vld [vmem:[%s594_s1] ss:$0 sm:$0xff]  ;;  %v38_v6 = vld [vmem:[%s593_s0 + $0x10] sm:$0xff]  ;;  %v39_v7 = vld [vmem:[%s593_s0 + $0x18] sm:$0xf]  ;;  %vm55_vm1 = vcmask 363520  }
   0x5   :  { %v47_v4 = vmul.f32 %v328_v2, %v36_v1  ;;  %v48_v5 = vmul.f32 %v328_v2, %v37_v3  ;;  %v49_v8 = vmul.f32 %v328_v2, %v38_v6  ;;  %v50_v9 = vmul.f32 %v328_v2, %v39_v7 }
   0x6   :  { %v445_v10 = vmov 0  }
   0x7   :  { %372 = vset.pattern.permute.xlu0 %v445_v10 }
   0x8   :  { %19 = vsyncpa [#allocation6], 0  ;;  %v52_v11 = vsel %vm51_vm0, %v47_v4, 0.0  ;;  %v59_v12 = vsel %vm51_vm0, %v49_v8, 0.0  ;;  %v56_v13 = vsel %vm55_vm1, %v48_v5, 0.0  ;;  %v62_v14 = vsel %vm55_vm1, %v50_v9, 0.0 }
   0x9   :  { %53 = vadd.xlane.f32.xlu0 %v52_v11  ;;  %60 = vadd.xlane.f32.xlu1 %v59_v12  ;;  %v329_v15 = vld [vmem:[#allocation2] ss:$0 sm:$0xff]  ;;  %v80_v17 = vld [vmem:[%s596_s3 + $0x8] sm:$0xf]  ;;  %vm119_vm2 = vcmask 1043456   ;;  %v446_v21 = vmov 0.0|0.0   ;;  %v92_v24 = vlaneseq }
   0xa   :  { %v79_v16 = vld [vmem:[%s596_s3] sm:$0xff]  ;;  %v195_v20 = vld [vmem:[%s598_s5 + $0x8] sm:$0xf]  ;;  %356 = vmatprep.subr.bf16.mxu0 %v446_v21  ;;  %360 = vmatprep.subr.bf16.mxu1 %v446_v21  ;;  %vm447_vm3 = vmmov 1   ;;  %vm448_vm5 = vmmov 0   ;;  %v449_v23 = vmov 0.0  }
   0xb   :  { %v194_v18 = vld [vmem:[%s598_s5] sm:$0xff]  ;;  %v357_v19 = vpack.c.bf16 %v80_v17, %v79_v16  ;;  %vm358_vm4 = vmpackc.low %vm119_vm2, %vm447_vm3  ;;  %346 = vmatprep.mubr.msk.f32.mxu0 %vm448_vm5, %v449_v23  ;;  %353 = vmatprep.mubr.msk.f32.mxu1 %vm448_vm5, %v449_v23  ;;  %v93_v26 = vand.u32 127, %v92_v24  ;;  %v95_v28 = vshrl.u32 %v92_v24, 7  ;;  %vm103_vm6 = vcmask 130112   ;;  %s450_s12 = smov [#allocation5]   ;;  %s451_s14 = smov [#allocation3]  }
   0xc   :  { %v361_v22 = vpack.c.bf16 %v195_v20, %v194_v18  ;;  %vm114_vm7 = vcmask 1041409   ;;  %vm116_vm8 = vcmask 97280   ;;  %v330_v46 = vld [vmem:[%s597_s4] ss:$0 sm:$0xff]  ;;  %s303_s13 = sshll.u32 %s450_s12, 4  ;;  %s293_s15 = sshll.u32 %s451_s14, 4  ;;  %s304_s13 = int_to_ptr.vmem [resolvable:$true] %s303_s13  ;;  %s544_s15 = int_to_ptr.vmem [resolvable:$true] %s293_s15 }
   0xd   :  { %57 = vadd.xlane.f32.xlu0 %v56_v13  ;;  %63 = vadd.xlane.f32.xlu1 %v62_v14  ;;  %v98_v29 = vadd.s32 4294967288, %v93_v26  ;;  %v96_v32 = vsub.s32 %v93_v26, %v95_v28  ;;  %v333_v47 = vld [vmem:[%s599_s6] ss:$0 sm:$0xff]  ;;  %vm277_vm9 = vcmask 91136   ;;  %s375_s4 = scalar_lea.vmem %s304_s13, 32  ;;  %p380_p1 = scmp.lt.s32.totalorder %s304_s13, %s304_s13 }
   0xe   :  { %359 = vmatpush3.bf16.msk.msra.mxu0 %vm358_vm4, %v357_v19  ;;  %363 = vmatpush3.bf16.msk.msra.mxu1 %vm358_vm4, %v361_v22  ;;  %p376_p0 = scmp.ne.s32.totalorder %s304_s13, %s375_s4  ;;  %p381_p2 = scmp.lt.s32.totalorder %s375_s4, %s375_s4 }
   0xf   :  { %v101_v33 = vsub.s32 %v98_v29, %v95_v28 }
  0x10   :  { %p382_p3 = por %p381_p2, %p380_p1 }
  0x12   :  { %p383_p4 = pnand %p382_p3, %p376_p0 }
  0x23   :  { %72 = vperm.xlu0 %372, %v329_v15  }
  0x96   :  { %v54_v25 = vpop.xlane.xlu0 %53  ;;  %v61_v27 = vpop.xlane.xlu1 %60 }
  0x9a   :  { %v58_v30 = vpop.xlane.xlu0 %57  ;;  %v64_v31 = vpop.xlane.xlu1 %63 }
  0xa2   :  { %v73_v34 = vpop.permute.xlu0 %72 }
  0xa3   :  { %v75_v35 = vadd.f32 %v73_v34, %v54_v25  ;;  %v76_v36 = vadd.f32 %v73_v34, %v58_v30  ;;  %v77_v37 = vadd.f32 %v73_v34, %v61_v27  ;;  %v78_v38 = vadd.f32 %v73_v34, %v64_v31 }
  0xa5   :  { %v97_v39 = vrot.slane %v75_v35, %v96_v32  ;;  %v102_v40 = vrot.slane %v76_v36, %v101_v33  ;;  %v108_v41 = vrot.slane %v77_v37, %v96_v32  ;;  %v112_v42 = vrot.slane %v78_v38, %v101_v33 }
  0xa7   :  { %v104_v43 = vsel %vm103_vm6, %v102_v40, %v97_v39  ;;  %v113_v44 = vsel %vm103_vm6, %v112_v42, %v108_v41 }
  0xa8   :  { %v115_v45 = vsel %vm114_vm7, %v113_v44, %v104_v43 }
  0xa9   :  { %347 = vmatmul.mubr.msk.f32.vlgmr.msra.gmra.mrb[0].mxu0 %vm116_vm8, %v115_v45  ;;  %354 = vmatmul.mubr.msk.f32.vlgmr.msra.gmra.mrb[0].mxu1 %vm116_vm8, %v115_v45 }
 0x17c   :  { %v189_v48 = vpop.f32.mrb[0].mxu0  ;;  %v272_v49 = vpop.f32.mrb[0].mxu1 }
 0x17d   :  { %v190_v50 = vadd.f32 %v330_v46, %v189_v48  ;;  %v273_v51 = vadd.f32 %v333_v47, %v272_v49  ;;  %v348_v52 = vpop.f32.mrb[1].mxu0  ;;  %v355_v53 = vpop.f32.mrb[1].mxu1 }
 0x17f   :  { %v193_v54 = vmax.f32 %v190_v50, 0.0  ;;  %v276_v55 = vmax.f32 %v273_v51, 0.0 }
 0x181   :  { %v281_v56 = vmul.f32 0.5, %v276_v55  ;;  %279 = vst.msk [vmem:[#allocation5] sm:$0x3] %vm277_vm9, %v276_v55  ;;  %278 = vst.msk [vmem:[#allocation3] sm:$0x3] %vm277_vm9, %v193_v54 }
 0x182   :  { %386 = shalt.err (!%p383_p4)
}
 0x183   :  { %s387_s17 = scalar_lea.hbm %s602_s9, 32 }
 0x184   :  { %p388_p5 = scmp.ne.s32.totalorder %s602_s9, %s387_s17  ;;  %p391_p6 = scmp.lt.u32.totalorder %s387_s17, %s602_s9 }
 0x186   :  { %p393_p7 = pnand %p391_p6, %p388_p5 }
 0x188   :  { %396 = shalt.err (!%p393_p7)
}
 0x189   :  { %306 = dma.vmem_to_hbm [thread:$0]  %s304_s13, 32, %s602_s9, [#allocation6]   ;;  %v282_v57 = vmul.f32 1.442695, %v281_v56 }
 0x18a   :  { %s397_s23 = scalar_lea.vmem %s544_s15, 32  ;;  %p402_p9 = scmp.lt.s32.totalorder %s544_s15, %s544_s15 }
 0x18b   :  { %p398_p8 = scmp.ne.s32.totalorder %s544_s15, %s397_s23  ;;  %p403_p10 = scmp.lt.s32.totalorder %s397_s23, %s397_s23 }
 0x18d   :  { %p404_p11 = por %p403_p10, %p402_p9 }
 0x18f   :  { %p405_p12 = pnand %p404_p11, %p398_p8 }
 0x191   :  { %408 = shalt.err (!%p405_p12)
}
 0x192   :  { %s409_s0 = scalar_lea.hbm %s601_s8, 32 }
 0x193   :  { %p410_p13 = scmp.ne.s32.totalorder %s601_s8, %s409_s0  ;;  %p413_p0 = scmp.lt.u32.totalorder %s409_s0, %s601_s8 }
 0x195   :  { %p415_p1 = pnand %p413_p0, %p410_p13 }
 0x197   :  { %418 = shalt.err (!%p415_p1)
}
 0x198   :  { %296 = dma.vmem_to_hbm [thread:$0]  %s544_s15, 32, %s601_s8, [#allocation4]   ;;  %373 = vpow2.f32 %v282_v57  ;;  %v280_v58 = vld [vmem:[%s600_s7] sm:$0x3] }
 0x199   :  { %s452_s30 = smov [#allocation7]  }
 0x19a   :  { %s313_s11 = sshll.u32 %s452_s30, 4  ;;  %s314_s11 = int_to_ptr.vmem [resolvable:$true] %s313_s11 }
 0x19b   :  { %s419_s12 = scalar_lea.vmem %s314_s11, 32  ;;  %p424_p3 = scmp.lt.s32.totalorder %s314_s11, %s314_s11 }
 0x19c   :  { %p420_p2 = scmp.ne.s32.totalorder %s314_s11, %s419_s12  ;;  %p425_p4 = scmp.lt.s32.totalorder %s419_s12, %s419_s12 }
 0x19e   :  { %p426_p5 = por %p425_p4, %p424_p3 }
 0x1a0   :  { %p427_p6 = pnand %p426_p5, %p420_p2 }
 0x1a2   :  { %v374_v59 = vpop.eup %373 }
 0x1a3   :  { %v284_v60 = vmul.f32 %v374_v59, %v280_v58 }
 0x1a5   :  { %v285_v61 = vadd.f32 %v284_v60, %v193_v54 }
 0x1a7   :  { %286 = vst.msk [vmem:[#allocation7] sm:$0x3] %vm277_vm9, %v285_v61 }
 0x1a8   :  { %430 = shalt.err (!%p427_p6)
}
 0x1a9   :  { %s431_s14 = scalar_lea.hbm %s603_s10, 32 }
 0x1aa   :  { %p432_p7 = scmp.ne.s32.totalorder %s603_s10, %s431_s14  ;;  %p435_p8 = scmp.lt.u32.totalorder %s431_s14, %s603_s10 }
 0x1ac   :  { %p437_p9 = pnand %p435_p8, %p432_p7 }
 0x1ae   :  { %440 = shalt.err (!%p437_p9)
}
 0x1af   :  { %316 = dma.vmem_to_hbm [thread:$0]  %s314_s11, 32, %s603_s10, [#allocation6]  }
 0x1b0   :  { %441 = dma.done.wait [#allocation4], 32  }
 0x1b1   :  { %442 = vsyncadd [#allocation4], 4294967264 }
 0x1b2   :  { %443 = dma.done.wait [#allocation6], 64  }
 0x1b3   :  { %444 = vsyncadd [#allocation6], 4294967232 }
 0x1b4   :  { %326 = vsyncpa [#allocation4], 1 }
 0x1b5   :  { %327 = vsyncpa [#allocation6], 1 }

</bundles_post_ra>
